<compile_context>
chip_gen: v6e
topology: v6e:2x2x1
jax: 0.10.0
libtpu: 0.0.40
codegen_flags: <defaults>
</compile_context>

<pallas_src>
import functools
import math

import jax
import jax.numpy as jnp
from jax.experimental import pallas as pl
from jax.experimental.pallas import tpu as pltpu


def _round_up(x, m):
    return (x + m - 1) // m * m


def _cdiv(a, b):
    return -(-a // b)


# ----------------------------------------------------------------------------
# Pallas kernel: fused (actor + critic) MLP + MVN log_prob, packed [B, 2] output.
# ----------------------------------------------------------------------------
def _actor_critic_kernel(
    sa_ref,
    w1_ref, b1_ref, w2_ref, b2_ref, w3_ref, b3_ref,
    out_ref,
    *, lp_const, neg_half_inv_var, dim_acts,
):
    sa = sa_ref[...]                                   # [bt, dim_acts+dim_states] f32
    actions = sa[:, :dim_acts]                         # f32 actions (lane offset 0)

    # Layers 1/2: bf16 MXU operands, f32 accumulation.  w1 has zero rows for the
    # action lanes, so dot(sa, w1) == dot(states, w1_orig) with no in-kernel slice.
    # Columns of layer 1: [0:64] actor hidden, [64:128] critic hidden.
    h = jnp.tanh(
        jnp.dot(sa.astype(jnp.bfloat16), w1_ref[...],
                preferred_element_type=jnp.float32) + b1_ref[...]
    )                                                  # [bt, 128] f32
    # Layer 2 (block-diagonal): cols [0:32] actor, cols [32:64] critic.
    h = jnp.tanh(
        jnp.dot(h.astype(jnp.bfloat16), w2_ref[...],
                preferred_element_type=jnp.float32) + b2_ref[...]
    )                                                  # [bt, 64] f32
    # Layer 3 (block-diagonal, padded to 8 lanes) kept in f32 operands:
    #   cols [0:dim_acts] -> actor pre-tanh mean, col [dim_acts] -> critic value.
    z = jnp.dot(h, w3_ref[...], preferred_element_type=jnp.float32) + b3_ref[...]  # [bt, 8]

    mu = jnp.tanh(z[:, :dim_acts])                     # [bt, dim_acts]
    value = z[:, dim_acts:dim_acts + 1]                # [bt, 1]

    # MVN(mu, diag(std)) log_prob; 1/std^2 and the constant term are closure scalars.
    diff = actions - mu
    maha = jnp.sum(diff * diff, axis=-1, keepdims=True)  # [bt, 1]
    logprob = lp_const + neg_half_inv_var * maha          # [bt, 1]

    out_ref[...] = jnp.concatenate([logprob, value], axis=-1)  # [bt, 2]


# ----------------------------------------------------------------------------
# Wrapper: weight fusion, constant hoisting, chip-specific tiling, pallas_call.
# ----------------------------------------------------------------------------
def fuse_params(params, dim_acts):
    """Fuse actor/critic linears into concatenated / block-diagonal weights.

    Layer 1/2 weights are cast to bf16 (MXU operands); biases and layer 3 stay f32.
    Layer 1 is prepended with dim_acts zero rows so the kernel can multiply the
    concatenated [actions | states] block directly.
    """
    f32 = jnp.float32
    bf16 = jnp.bfloat16
    h1a = params["w1a"].shape[1]          # 64
    h1c = params["w1c"].shape[1]          # 64
    h2a = params["w2a"].shape[1]          # 32
    h2c = params["w2c"].shape[1]          # 32

    w1 = jnp.concatenate([params["w1a"], params["w1c"]], axis=1)          # [ds, 128]
    w1 = jnp.concatenate([jnp.zeros((dim_acts, h1a + h1c), f32), w1], 0)  # [da+ds, 128]
    b1 = jnp.concatenate([params["b1a"], params["b1c"]], axis=1)          # [1, 128]

    w2 = jnp.concatenate(
        [
            jnp.concatenate([params["w2a"], jnp.zeros((h1a, h2c), f32)], axis=1),
            jnp.concatenate([jnp.zeros((h1c, h2a), f32), params["w2c"]], axis=1),
        ],
        axis=0,
    )                                                                     # [128, 64]
    b2 = jnp.concatenate([params["b2a"], params["b2c"]], axis=1)          # [1, 64]

    out3 = dim_acts + 1
    out3_pad = max(8, _round_up(out3, 8))                                 # lane-friendly pad
    w3 = jnp.concatenate(
        [
            jnp.concatenate([params["w3a"], jnp.zeros((h2a, 1), f32)], axis=1),
            jnp.concatenate([jnp.zeros((h2c, dim_acts), f32), params["w3c"]], axis=1),
        ],
        axis=0,
    )                                                                     # [64, dim_acts+1]
    w3 = jnp.pad(w3, ((0, 0), (0, out3_pad - out3)))                      # [64, 8]
    b3 = jnp.pad(
        jnp.concatenate([params["b3a"], params["b3c"]], axis=1),
        ((0, 0), (0, out3_pad - out3)),
    )                                                                     # [1, 8]
    return w1.astype(bf16), b1, w2.astype(bf16), b2, w3, b3


def _chip_tuning():
    """Per-generation (block_b, vmem_limit_bytes) defaults from the perf review."""
    try:
        kind = jax.devices()[0].device_kind.lower()
    except Exception:  # pragma: no cover - defensive
        kind = ""
    if "v5e" in kind or "v5 lite" in kind or "v5lite" in kind:
        # v5e: 16 MiB default scoped VMEM -> smaller tiles + raised limit.
        return 2048, 64 << 20
    if "v6" in kind:
        # v6e: 128 MiB physical VMEM -> bigger tiles amortize per-step overhead.
        return 8192, 96 << 20
    if "7x" in kind or "v7" in kind:
        # v7x: 64 MiB physical / 32 MiB scoped per TC -> keep tiles <= 4096.
        return 4096, 48 << 20
    # Unknown chip: conservative tile, leave the scoped-VMEM default alone.
    return 2048, None


def actor_critic_calculation(states, actions, params, action_std,
                             *, block_b=None, vmem_limit_bytes=None):
    """Fused Pallas forward. Returns (logprob[B], value[B], entropy[B])."""
    states = states.astype(jnp.float32)
    actions = actions.astype(jnp.float32)
    B, dim_states = states.shape
    dim_acts = actions.shape[1]
    din = dim_acts + dim_states

    if block_b is None or vmem_limit_bytes is None:
        tuned_b, tuned_v = _chip_tuning()
        if block_b is None:
            block_b = tuned_b
        if vmem_limit_bytes is None:
            vmem_limit_bytes = tuned_v

    w1, b1, w2, b2, w3, b3 = fuse_params(params, dim_acts)

    # ---- batch-invariant constants, hoisted out of the kernel ----
    log_two_pi = math.log(2.0 * math.pi)
    log_det = dim_acts * math.log(action_std)                  # sum(log(diag(L)))
    lp_const = -log_det - 0.5 * dim_acts * log_two_pi
    ent_const = 0.5 * dim_acts * (1.0 + log_two_pi) + log_det
    neg_half_inv_var = -0.5 / (action_std * action_std)

    # ---- single streamed input: [actions | states] (halves input DMA / VMEM) ----
    sa = jnp.concatenate([actions, states], axis=1)            # [B, din]

    # ---- batch tiling: >=2 blocks for large batches (v7x megacore), bt % 16 == 0 ----
    num_blocks = _cdiv(B, block_b)
    if num_blocks < 2 and B >= 256:
        num_blocks = 2
    bt = _round_up(_cdiv(B, num_blocks), 16)
    Bp = bt * num_blocks
    if Bp != B:
        sa = jnp.pad(sa, ((0, Bp - B), (0, 0)))

    kernel = functools.partial(
        _actor_critic_kernel,
        lp_const=lp_const,
        neg_half_inv_var=neg_half_inv_var,
        dim_acts=dim_acts,
    )

    def resident(arr):
        # Full-array block with constant index: DMA'd once, stays VMEM-resident.
        return pl.BlockSpec(arr.shape, lambda i: (0, 0))

    cost = pl.CostEstimate(
        flops=int(2 * Bp * (din * 128 + 128 * 64 + 64 * 8) + 8 * Bp * dim_acts),
        transcendentals=int(Bp * (128 + 64 + dim_acts)),
        bytes_accessed=int(
            Bp * (din + 2) * 4
            + 2 * (w1.size + w2.size)
            + 4 * (w3.size + b1.size + b2.size + b3.size)
        ),
    )

    cp_kwargs = dict(dimension_semantics=("parallel",))        # 2x on v7x megacore
    if vmem_limit_bytes is not None:
        cp_kwargs["vmem_limit_bytes"] = int(vmem_limit_bytes)

    out = pl.pallas_call(
        kernel,
        out_shape=jax.ShapeDtypeStruct((Bp, 2), jnp.float32),
        grid=(num_blocks,),
        in_specs=[
            pl.BlockSpec((bt, din), lambda i: (i, 0)),          # [actions|states] streamed
            resident(w1), resident(b1),
            resident(w2), resident(b2),
            resident(w3), resident(b3),
        ],
        out_specs=pl.BlockSpec((bt, 2), lambda i: (i, 0)),
        compiler_params=pltpu.CompilerParams(**cp_kwargs),
        cost_estimate=cost,
    )(sa, w1, b1, w2, b2, w3, b3)

    logprob = out[:B, 0]
    value = out[:B, 1]
    entropy = jnp.full((B,), ent_const, jnp.float32)
    return logprob, value, entropy


# ----------------------------------------------------------------------------
# Deterministic parameter init (PyTorch nn.Linear default: U(-1/sqrt(in), 1/sqrt(in)))
# ----------------------------------------------------------------------------
def init_linear(key, fan_in, fan_out):
    kw, kb = jax.random.split(key)
    bound = 1.0 / math.sqrt(fan_in)
    w = jax.random.uniform(kw, (fan_in, fan_out), jnp.float32, -bound, bound)
    b = jax.random.uniform(kb, (1, fan_out), jnp.float32, -bound, bound)
    return w, b


def init_params(key, dim_states, dim_acts):
    keys = jax.random.split(key, 6)
    p = {}
    p["w1a"], p["b1a"] = init_linear(keys[0], dim_states, 64)
    p["w2a"], p["b2a"] = init_linear(keys[1], 64, 32)
    p["w3a"], p["b3a"] = init_linear(keys[2], 32, dim_acts)
    p["w1c"], p["b1c"] = init_linear(keys[3], dim_states, 64)
    p["w2c"], p["b2c"] = init_linear(keys[4], 64, 32)
    p["w3c"], p["b3c"] = init_linear(keys[5], 32, 1)
    return p


# ----------------------------------------------------------------------------
# Pure-JAX references for correctness checks.
# ----------------------------------------------------------------------------
def _mvn_terms(actions, mu, action_std):
    d = mu.shape[-1]
    log_two_pi = math.log(2.0 * math.pi)
    log_det = d * math.log(action_std)
    diff = (actions - mu) / action_std
    logprob = -0.5 * jnp.sum(diff * diff, axis=-1) - log_det - 0.5 * d * log_two_pi
    entropy = jnp.full((mu.shape[0],), 0.5 * d * (1.0 + log_two_pi) + log_det)
    return logprob, entropy


def reference_calculation_f32(states, actions, params, action_std):
    """Exact f32 math (semantic reference)."""
    h = jnp.tanh(states @ params["w1a"] + params["b1a"])
    h = jnp.tanh(h @ params["w2a"] + params["b2a"])
    mu = jnp.tanh(h @ params["w3a"] + params["b3a"])
    logprob, entropy = _mvn_terms(actions, mu, action_std)

    hc = jnp.tanh(states @ params["w1c"] + params["b1c"])
    hc = jnp.tanh(hc @ params["w2c"] + params["b2c"])
    value = (hc @ params["w3c"] + params["b3c"])[:, 0]
    return logprob, value, entropy


def reference_calculation_bf16(states, actions, params, action_std):
    """Reference matching the kernel's precision: bf16 MXU operands for layers 1-2."""
    bf = jnp.bfloat16

    def dot_bf16(x, w):
        return jnp.dot(x.astype(bf), w.astype(bf), preferred_element_type=jnp.float32)

    h = jnp.tanh(dot_bf16(states, params["w1a"]) + params["b1a"])
    h = jnp.tanh(dot_bf16(h, params["w2a"]) + params["b2a"])
    mu = jnp.tanh(h @ params["w3a"] + params["b3a"])
    logprob, entropy = _mvn_terms(actions, mu, action_std)

    hc = jnp.tanh(dot_bf16(states, params["w1c"]) + params["b1c"])
    hc = jnp.tanh(dot_bf16(hc, params["w2c"]) + params["b2c"])
    value = (hc @ params["w3c"] + params["b3c"])[:, 0]
    return logprob, value, entropy


if __name__ == "__main__":
    # BipedalWalker-v3: dim_states=24, dim_acts=4
    dim_states, dim_acts = 24, 4
    action_std = 0.5

    key = jax.random.PRNGKey(0)
    k_params, k_s1, k_a1, k_s2, k_a2, k_s3, k_a3 = jax.random.split(key, 7)
    params = init_params(k_params, dim_states, dim_acts)

    def run_and_check(ks, ka, batch, **kw):
        s = jax.random.normal(ks, (batch, dim_states), jnp.float32)
        a = jax.random.normal(ka, (batch, dim_acts), jnp.float32)
        lp, v, e = actor_critic_calculation(s, a, params, action_std, **kw)
        jax.block_until_ready((lp, v, e))

        # Tight check vs. a reference using identical precision (bf16 matmul operands).
        rlp, rv, re = reference_calculation_bf16(s, a, params, action_std)
        assert jnp.allclose(lp, rlp, rtol=5e-3, atol=5e-3)
        assert jnp.allclose(v, rv, rtol=5e-3, atol=5e-3)
        assert jnp.allclose(e, re, rtol=1e-5, atol=1e-5)

        # Looser sanity check vs. the exact f32 semantics (bf16 quantization slack).
        flp, fv, fe = reference_calculation_f32(s, a, params, action_std)
        assert jnp.allclose(lp, flp, rtol=2e-2, atol=5e-2)
        assert jnp.allclose(v, fv, rtol=2e-2, atol=5e-2)
        assert jnp.allclose(e, fe, rtol=1e-5, atol=1e-5)

    # --- small batch (single grid step, batch padding to 16) ---
    run_and_check(k_s1, k_a1, 8)

    # --- multi-block tiling + batch padding (explicit small block size) ---
    run_and_check(k_s2, k_a2, 200, block_b=64)

    # --- chip-default tile / VMEM settings + forced >=2 blocks (megacore path) ---
    run_and_check(k_s3, k_a3, 600)

    print("KERNEL_OK")
</pallas_src>

<mosaic_0001>
module attributes {stable_mosaic.version = 11 : i64} {
  func.func @_actor_critic_kernel(%arg0: i32, %arg1: memref<16x28xf32, #tpu.memory_space<vmem>>, %arg2: memref<28x128xbf16, #tpu.memory_space<vmem>>, %arg3: memref<1x128xf32, #tpu.memory_space<vmem>>, %arg4: memref<128x64xbf16, #tpu.memory_space<vmem>>, %arg5: memref<1x64xf32, #tpu.memory_space<vmem>>, %arg6: memref<64x8xf32, #tpu.memory_space<vmem>>, %arg7: memref<1x8xf32, #tpu.memory_space<vmem>>, %arg8: memref<16x2xf32, #tpu.memory_space<vmem>>) attributes {dimension_semantics = [#tpu.dimension_semantics<parallel>], iteration_bounds = array<i64: 1>, scalar_prefetch = 0 : i64, scratch_operands = 0 : i64, tpu.core_type = #tpu.core_type<tc>, window_params = [{transform_indices = @transform_0, window_bounds = array<i64: 16, 28>}, {pipeline_mode = #tpu.pipeline_mode<synchronous>, transform_indices = @transform_1, window_bounds = array<i64: 28, 128>}, {pipeline_mode = #tpu.pipeline_mode<synchronous>, transform_indices = @transform_2, window_bounds = array<i64: 1, 128>}, {pipeline_mode = #tpu.pipeline_mode<synchronous>, transform_indices = @transform_3, window_bounds = array<i64: 128, 64>}, {pipeline_mode = #tpu.pipeline_mode<synchronous>, transform_indices = @transform_4, window_bounds = array<i64: 1, 64>}, {pipeline_mode = #tpu.pipeline_mode<synchronous>, transform_indices = @transform_5, window_bounds = array<i64: 64, 8>}, {pipeline_mode = #tpu.pipeline_mode<synchronous>, transform_indices = @transform_6, window_bounds = array<i64: 1, 8>}, {transform_indices = @transform_7, window_bounds = array<i64: 16, 2>}]} {
    %c0 = arith.constant 0 : index
    %c0_0 = arith.constant 0 : index
    %0 = vector.load %arg1[%c0, %c0_0] : memref<16x28xf32, #tpu.memory_space<vmem>>, vector<16x28xf32>
    %1 = vector.extract_strided_slice %0 {offsets = [0, 0], sizes = [16, 4], strides = [1, 1]} : vector<16x28xf32> to vector<16x4xf32>
    %2 = arith.truncf %0 : vector<16x28xf32> to vector<16x28xbf16>
    %c0_1 = arith.constant 0 : index
    %c0_2 = arith.constant 0 : index
    %3 = vector.load %arg2[%c0_1, %c0_2] : memref<28x128xbf16, #tpu.memory_space<vmem>>, vector<28x128xbf16>
    %cst = arith.constant dense<0.000000e+00> : vector<16x128xf32>
    %4 = tpu.matmul %2, %3, %cst {dimension_numbers = #tpu.dot_dimension_numbers<[1], [0], [0], [1], [0, 0, 1, 1], [], []>} : vector<16x28xbf16>, vector<28x128xbf16>, vector<16x128xf32> -> vector<16x128xf32>
    %c0_3 = arith.constant 0 : index
    %c0_4 = arith.constant 0 : index
    %5 = vector.load %arg3[%c0_3, %c0_4] : memref<1x128xf32, #tpu.memory_space<vmem>>, vector<1x128xf32>
    %6 = vector.broadcast %5 : vector<1x128xf32> to vector<16x128xf32>
    %7 = arith.addf %4, %6 : vector<16x128xf32>
    %8 = math.tanh %7 : vector<16x128xf32>
    %9 = arith.truncf %8 : vector<16x128xf32> to vector<16x128xbf16>
    %c0_5 = arith.constant 0 : index
    %c0_6 = arith.constant 0 : index
    %10 = vector.load %arg4[%c0_5, %c0_6] : memref<128x64xbf16, #tpu.memory_space<vmem>>, vector<128x64xbf16>
    %cst_7 = arith.constant dense<0.000000e+00> : vector<16x64xf32>
    %11 = tpu.matmul %9, %10, %cst_7 {dimension_numbers = #tpu.dot_dimension_numbers<[1], [0], [0], [1], [0, 0, 1, 1], [], []>} : vector<16x128xbf16>, vector<128x64xbf16>, vector<16x64xf32> -> vector<16x64xf32>
    %c0_8 = arith.constant 0 : index
    %c0_9 = arith.constant 0 : index
    %12 = vector.load %arg5[%c0_8, %c0_9] : memref<1x64xf32, #tpu.memory_space<vmem>>, vector<1x64xf32>
    %13 = vector.broadcast %12 : vector<1x64xf32> to vector<16x64xf32>
    %14 = arith.addf %11, %13 : vector<16x64xf32>
    %15 = math.tanh %14 : vector<16x64xf32>
    %c0_10 = arith.constant 0 : index
    %c0_11 = arith.constant 0 : index
    %16 = vector.load %arg6[%c0_10, %c0_11] : memref<64x8xf32, #tpu.memory_space<vmem>>, vector<64x8xf32>
    %cst_12 = arith.constant dense<0.000000e+00> : vector<16x8xf32>
    %17 = tpu.matmul %15, %16, %cst_12 {dimension_numbers = #tpu.dot_dimension_numbers<[1], [0], [0], [1], [0, 0, 1, 1], [], []>} : vector<16x64xf32>, vector<64x8xf32>, vector<16x8xf32> -> vector<16x8xf32>
    %c0_13 = arith.constant 0 : index
    %c0_14 = arith.constant 0 : index
    %18 = vector.load %arg7[%c0_13, %c0_14] : memref<1x8xf32, #tpu.memory_space<vmem>>, vector<1x8xf32>
    %19 = vector.broadcast %18 : vector<1x8xf32> to vector<16x8xf32>
    %20 = arith.addf %17, %19 : vector<16x8xf32>
    %21 = vector.extract_strided_slice %20 {offsets = [0, 0], sizes = [16, 4], strides = [1, 1]} : vector<16x8xf32> to vector<16x4xf32>
    %22 = math.tanh %21 : vector<16x4xf32>
    %23 = vector.extract_strided_slice %20 {offsets = [0, 4], sizes = [16, 1], strides = [1, 1]} : vector<16x8xf32> to vector<16x1xf32>
    %24 = arith.subf %1, %22 : vector<16x4xf32>
    %25 = arith.mulf %24, %24 : vector<16x4xf32>
    %cst_15 = arith.constant dense<0.000000e+00> : vector<16xf32>
    %26 = vector.multi_reduction <add>, %25, %cst_15 [1] : vector<16x4xf32> to vector<16xf32>
    %27 = vector.shape_cast %26 : vector<16xf32> to vector<16x1xf32>
    %cst_16 = arith.constant -2.000000e+00 : f32
    %28 = vector.broadcast %cst_16 : f32 to vector<16x1xf32>
    %29 = arith.mulf %28, %27 : vector<16x1xf32>
    %cst_17 = arith.constant -0.9031654 : f32
    %30 = vector.broadcast %cst_17 : f32 to vector<16x1xf32>
    %31 = arith.addf %30, %29 : vector<16x1xf32>
    %32 = tpu.concatenate %31, %23 in 1 : vector<16x1xf32>, vector<16x1xf32> -> vector<16x2xf32>
    %c0_18 = arith.constant 0 : index
    %c0_19 = arith.constant 0 : index
    %33 = vector.load %arg8[%c0_18, %c0_19] : memref<16x2xf32, #tpu.memory_space<vmem>>, vector<16x2xf32>
    tpu.vector_store %arg8[%c0_18, %c0_19], %32 {strides = array<i32>} : memref<16x2xf32, #tpu.memory_space<vmem>>, vector<16x2xf32>,
    return
  }
  func.func @transform_0(%arg0: i32) -> (i32, i32) {
    %c0_i32 = arith.constant 0 : i32
    %c0_i32_0 = arith.constant 0 : i32
    return %arg0, %c0_i32 : i32, i32
  }
  func.func @transform_1(%arg0: i32) -> (i32, i32) {
    %c0_i32 = arith.constant 0 : i32
    %c0_i32_0 = arith.constant 0 : i32
    %c0_i32_1 = arith.constant 0 : i32
    return %c0_i32, %c0_i32_0 : i32, i32
  }
  func.func @transform_2(%arg0: i32) -> (i32, i32) {
    %c0_i32 = arith.constant 0 : i32
    %c0_i32_0 = arith.constant 0 : i32
    %c0_i32_1 = arith.constant 0 : i32
    return %c0_i32, %c0_i32_0 : i32, i32
  }
  func.func @transform_3(%arg0: i32) -> (i32, i32) {
    %c0_i32 = arith.constant 0 : i32
    %c0_i32_0 = arith.constant 0 : i32
    %c0_i32_1 = arith.constant 0 : i32
    return %c0_i32, %c0_i32_0 : i32, i32
  }
  func.func @transform_4(%arg0: i32) -> (i32, i32) {
    %c0_i32 = arith.constant 0 : i32
    %c0_i32_0 = arith.constant 0 : i32
    %c0_i32_1 = arith.constant 0 : i32
    return %c0_i32, %c0_i32_0 : i32, i32
  }
  func.func @transform_5(%arg0: i32) -> (i32, i32) {
    %c0_i32 = arith.constant 0 : i32
    %c0_i32_0 = arith.constant 0 : i32
    %c0_i32_1 = arith.constant 0 : i32
    return %c0_i32, %c0_i32_0 : i32, i32
  }
  func.func @transform_6(%arg0: i32) -> (i32, i32) {
    %c0_i32 = arith.constant 0 : i32
    %c0_i32_0 = arith.constant 0 : i32
    %c0_i32_1 = arith.constant 0 : i32
    return %c0_i32, %c0_i32_0 : i32, i32
  }
  func.func @transform_7(%arg0: i32) -> (i32, i32) {
    %c0_i32 = arith.constant 0 : i32
    %c0_i32_0 = arith.constant 0 : i32
    return %arg0, %c0_i32 : i32, i32
  }
}

</mosaic_0001>

<bundles_post_ra>
// kernel: tpu_custom_call.1
= control target key start
LH: loop header
LB: loop body
LE: loop exit
PB: predicated region body
PF: predicated region fallthrough
CT: control target
= control target key end

     0   :  { %vm56_vm0 = vcmask 1045504   ;;  %v460_v0 = vmov 0.0   ;;  %vm461_vm1 = vmmov 0   ;;  %vm52_vm2 = vcmask 228352   ;;  %s586_s1 = inlined_call_operand.vmem [shape: bf16[28,128], index: 1, kind: input, shape index: {}]   ;;  %s587_s0 = inlined_call_operand.vmem [shape: f32[16,28], index: 0, kind: input, shape index: {}]   ;;  %s588_s3 = inlined_call_operand.vmem [shape: bf16[128,64], index: 3, kind: input, shape index: {}]   ;;  %s589_s2 = inlined_call_operand.vmem [shape: f32[1,128], index: 2, kind: input, shape index: {}]   ;;  %s590_s5 = inlined_call_operand.vmem [shape: f32[64,8], index: 5, kind: input, shape index: {}]   ;;  %s591_s4 = inlined_call_operand.vmem [shape: f32[1,64], index: 4, kind: input, shape index: {}]   ;;  %s592_s6 = inlined_call_operand.vmem [shape: f32[1,8], index: 6, kind: input, shape index: {}]   ;;  %s593_s7 = inlined_call_operand.vmem [shape: f32[16,2], index: 7, kind: output, shape index: {}]  }
   0x1   :  { %388 = vmatprep.subr.bf16.mxu0 %v460_v0  ;;  %v438_v1 = vld [vmem:[%s586_s1 + $0x8] sm:$0x3f]   ;;  %392 = vmatprep.mubr.msk.bf16.mxu0 %vm461_vm1, %v460_v0  ;;  %v439_v2 = vld [vmem:[%s586_s1] sm:$0xff]   ;;  %v440_v6 = vld [vmem:[%s588_s3 + $0x38] sm:$0xff]   ;;  %vm233_vm3 = vcmask 523264   ;;  %vm321_vm4 = vcmask 31744  }
   0x2   :  { %396 = vmatprep.subr.bf16.mxu1 %v460_v0  ;;  %412 = vmatprep.mubr.msk.bf16.mxu1 %vm461_vm1, %v460_v0  ;;  %v58_v3 = vsel %vm56_vm0, %v438_v1, 0  ;;  %v512_v4 = vld [vmem:[%s587_s0] sm:$0xff]  ;;  %v517_v5 = vld [vmem:[%s587_s0 + $0x8] sm:$0xff]  ;;  %v441_v7 = vld [vmem:[%s588_s3 + $0x30] sm:$0xff]   ;;  %vm340_vm5 = vcmask 7168   ;;  %vm343_vm6 = vcmask 15360  }
   0x3   :  { %389 = vmatpush3.bf16.msra.mxu0 %v58_v3  ;;  %397 = vmatpush3.bf16.msra.mxu1 %v440_v6  ;;  %v29_v8 = vpack.c.bf16 %v517_v5, %v512_v4  ;;  %v442_v9 = vld [vmem:[%s588_s3 + $0x28] sm:$0xff]   ;;  %v443_v10 = vld [vmem:[%s588_s3 + $0x20] sm:$0xff]   ;;  %v444_v11 = vld [vmem:[%s588_s3 + $0x18] sm:$0xff]  }
   0x4   :  { %390 = vmatprep.subr.bf16.mxu0 %v460_v0  ;;  %398 = vmatprep.subr.bf16.mxu1 %v460_v0  ;;  %v445_v12 = vld [vmem:[%s588_s3 + $0x10] sm:$0xff]   ;;  %v446_v13 = vld [vmem:[%s588_s3 + $0x8] sm:$0xff]   ;;  %v447_v14 = vld [vmem:[%s588_s3] sm:$0xff]  }
   0x5   :  { %v350_v15 = vld [vmem:[%s589_s2] ss:$0 sm:$0xff]  ;;  %v225_v25 = vld [vmem:[%s590_s5 + $0x38] sm:$0xff]  ;;  %v224_v26 = vld [vmem:[%s590_s5 + $0x30] sm:$0xff] }
   0x6   :  { %v223_v27 = vld [vmem:[%s590_s5 + $0x28] sm:$0xff]  ;;  %v222_v28 = vld [vmem:[%s590_s5 + $0x20] sm:$0xff]  ;;  %v221_v29 = vld [vmem:[%s590_s5 + $0x18] sm:$0xff] }
   0x7   :  { %391 = vmatpush3.bf16.msra.mxu0 %v439_v2  ;;  %399 = vmatpush3.bf16.msra.mxu1 %v441_v7  ;;  %v220_v30 = vld [vmem:[%s590_s5 + $0x10] sm:$0xff]  ;;  %v219_v31 = vld [vmem:[%s590_s5 + $0x8] sm:$0xff]  ;;  %v218_v32 = vld [vmem:[%s590_s5] sm:$0xff] }
   0x8   :  { %400 = vmatprep.subr.bf16.mxu1 %v460_v0  ;;  %416 = vmatprep.subr.mxu0 %v225_v25  ;;  %v354_v33 = vld [vmem:[%s591_s4] ss:$0 sm:$0xff]  ;;  %s462_s4 = smov 125  }
   0x9   :  { %v363_v42 = vld [vmem:[%s592_s6] ss:$0 sm:$0xff] }
   0xa   :  { %393 = vmatmul.mubr.msk.bf16.vlgmr.msra.gmra.mxu0 %vm52_vm2, %v29_v8 }
   0xb   :  { %401 = vmatpush3.bf16.msra.mxu1 %v442_v9  ;;  %417 = vmatpush3.msra.mxu0 %v225_v25 }
   0xc   :  { %402 = vmatprep.subr.bf16.mxu1 %v460_v0  ;;  %418 = vmatprep.subr.mxu0 %v224_v26 }
   0xd   :  { %419 = vmatpush3.msra.mxu0 %v224_v26 }
   0xe   :  { %420 = vmatprep.subr.mxu0 %v223_v27 }
   0xf   :  { %403 = vmatpush3.bf16.msra.mxu1 %v443_v10  ;;  %421 = vmatpush3.msra.mxu0 %v223_v27 }
  0x10   :  { %404 = vmatprep.subr.bf16.mxu1 %v460_v0  ;;  %422 = vmatprep.subr.mxu0 %v222_v28 }
  0x11   :  { %423 = vmatpush3.msra.mxu0 %v222_v28 }
  0x12   :  { %424 = vmatprep.subr.mxu0 %v221_v29 }
  0x13   :  { %405 = vmatpush3.bf16.msra.mxu1 %v444_v11  ;;  %425 = vmatpush3.msra.mxu0 %v221_v29 }
  0x14   :  { %406 = vmatprep.subr.bf16.mxu1 %v460_v0  ;;  %426 = vmatprep.subr.mxu0 %v220_v30 }
  0x15   :  { %427 = vmatpush3.msra.mxu0 %v220_v30 }
  0x16   :  { %428 = vmatprep.subr.mxu0 %v219_v31 }
  0x17   :  { %407 = vmatpush3.bf16.msra.mxu1 %v445_v12  ;;  %429 = vmatpush3.msra.mxu0 %v219_v31 }
  0x18   :  { %408 = vmatprep.subr.bf16.mxu1 %v460_v0  ;;  %430 = vmatprep.subr.mxu0 %v218_v32 }
  0x19   :  { %431 = vmatpush3.msra.mxu0 %v218_v32 }
  0x1b   :  { %409 = vmatpush3.bf16.msra.mxu1 %v446_v13 }
  0x1c   :  { %410 = vmatprep.subr.bf16.mxu1 %v460_v0 }
  0x1f   :  { %411 = vmatpush3.bf16.msra.mxu1 %v447_v14 }
  0xca   :  { %v94_v16 = vpop.f32.mrf.mxu0 }
  0xcb   :  { %v95_v17 = vadd.f32 %v350_v15, %v94_v16 }
  0xcc   :  { %v394_v18 = vpop.f32.mrf.mxu0 }
  0xcd   :  { %448 = vtanh.f32 %v95_v17 }
  0xce   :  { %v97_v19 = vpop.f32.mrf.mxu0 }
  0xcf   :  { %v98_v20 = vadd.f32 %v350_v15, %v97_v19 }
  0xd0   :  { %v395_v21 = vpop.f32.mrf.mxu0 }
  0xd1   :  { %450 = vtanh.f32 %v98_v20 }
  0xda   :  { %v449_v22 = vpop.eup %448 }
  0xde   :  { %v451_v23 = vpop.eup %450 }
  0xdf   :  { %v103_v24 = vpack.c.bf16 %v451_v23, %v449_v22 }
  0xe1   :  { %413 = vmatmul.mubr.bf16.vlgmr.msra.gmra.mxu1 %v103_v24 }
 0x1a1   :  { %v209_v34 = vpop.f32.mrf.mxu1 }
 0x1a2   :  { %v210_v35 = vadd.f32 %v354_v33, %v209_v34 }
 0x1a3   :  { %v414_v36 = vpop.f32.mrf.mxu1 }
 0x1a4   :  { %452 = vtanh.f32 %v210_v35 }
 0x1a5   :  { %v212_v37 = vpop.f32.mrf.mxu1 }
 0x1a6   :  { %v213_v38 = vadd.f32 %v354_v33, %v212_v37 }
 0x1a7   :  { %v415_v39 = vpop.f32.mrf.mxu1 }
 0x1a8   :  { %454 = vtanh.f32 %v213_v38 }
 0x1b1   :  { %v453_v40 = vpop.eup %452 }
 0x1b2   :  { %432 = vmatprep.mubr.msk.f32.mxu0 %vm233_vm3, %v453_v40 }
 0x1b5   :  { %v455_v41 = vpop.eup %454 }
 0x1b6   :  { %433 = vmatmul.mubr.msk.f32.vlgmr.msra.gmra.mxu0 %vm233_vm3, %v455_v41 }
 0x276   :  { %v434_v43 = vpop.f32.mrf.mxu0 }
 0x277   :  { %v312_v44 = vadd.f32 %v434_v43, %v363_v42 }
 0x278   :  { %v306_v45 = vpop.f32.mrf.mxu0 }
 0x279   :  { %456 = vtanh.f32 %v312_v44  ;;  %v307_v46 = vadd.f32 %v363_v42, %v306_v45 }
 0x27b   :  { %458 = vtanh.f32 %v307_v46  ;;  %334 = vrot.lane.b32.xlu1 %v307_v46, %s462_s4 }
 0x27f   :  { %336 = vrot.lane.b32.xlu1 %v312_v44, %s462_s4 }
 0x286   :  { %v457_v47 = vpop.eup %456 }
 0x287   :  { %v318_v50 = vsub.f32 %v517_v5, %v457_v47 }
 0x288   :  { %v459_v48 = vpop.eup %458 }
 0x289   :  { %v317_v49 = vsub.f32 %v512_v4, %v459_v48  ;;  %v320_v53 = vmul.f32 %v318_v50, %v318_v50 }
 0x28b   :  { %v319_v51 = vmul.f32 %v317_v49, %v317_v49  ;;  %v325_v54 = vsel %vm321_vm4, %v320_v53, 0.0 }
 0x28d   :  { %v322_v52 = vsel %vm321_vm4, %v319_v51, 0.0 }
 0x28e   :  { %323 = vadd.xlane.f32.xlu0 %v322_v52 }
 0x292   :  { %326 = vadd.xlane.f32.xlu0 %v325_v54 }
 0x2ed   :  { %v335_v57 = vpop.permute.xlu1 %334 }
 0x2f1   :  { %v337_v63 = vpop.permute.xlu1 %336 }
 0x317   :  { %v324_v55 = vpop.xlane.xlu0 %323 }
 0x318   :  { %v328_v56 = vmul.f32 -2.0, %v324_v55 }
 0x31a   :  { %v330_v58 = vadd.f32 -0.9031654, %v328_v56 }
 0x31b   :  { %v327_v59 = vpop.xlane.xlu0 %326 }
 0x31c   :  { %v341_v60 = vsel %vm340_vm5, %v330_v58, %v335_v57  ;;  %v329_v61 = vmul.f32 -2.0, %v327_v59 }
 0x31d   :  { %344 = vst.msk [vmem:[%s593_s7] sm:$0xff] %vm343_vm6, %v341_v60 }
 0x31e   :  { %v331_v62 = vadd.f32 -0.9031654, %v329_v61 }
 0x320   :  { %v342_v0 = vsel %vm340_vm5, %v331_v62, %v337_v63 }
 0x321   :  { %345 = vst.msk [vmem:[%s593_s7 + $0x8] sm:$0xff] %vm343_vm6, %v342_v0 }

</bundles_post_ra>
